<compile_context>
chip_gen: v6e
topology: v6e:2x2x1
jax: 0.10.0
libtpu: 0.0.40
codegen_flags: <defaults>
</compile_context>

<pallas_src>
import functools

import jax
import jax.numpy as jnp
from jax.experimental import pallas as pl
from jax.experimental.pallas import tpu as pltpu

BN_EPS = 1e-5


def _round_up(x, m):
    return ((x + m - 1) // m) * m


# ---------------------------------------------------------------------------
# Fused kernel: conv1 + BN(batch stats) + conv2(3x3) + tanh
# ---------------------------------------------------------------------------
def _make_fused_kernel(*, tile_m, m1, w1_sp, c2p, guard):
    """Closure constants: tile_m (rows/tile), m1 (# valid rows), w1_sp (W of the
    conv1 output grid), c2p (lane-padded out channels), guard (halo rows)."""
    taps = [(dh, dw) for dh in (-1, 0, 1) for dw in (-1, 0, 1)]

    def kernel(p1_ref, mask_ref, w1_ref, b1_ref, gamma_ref, beta_ref,
               w2_ref, b2_ref, o_ref,
               o1_ref, sum_ref, ssq_ref, scale_ref, shift_ref):
        phase = pl.program_id(0)
        i = pl.program_id(1)

        # ---------------- phase 0: conv1 + bias, accumulate BN stats --------
        @pl.when(phase == 0)
        def _():
            @pl.when(i == 0)
            def _():
                # zero the intermediate (covers halo/guard rows that phase 1
                # reads shifted) and the statistic accumulators
                o1_ref[...] = jnp.zeros_like(o1_ref)
                sum_ref[...] = jnp.zeros_like(sum_ref)
                ssq_ref[...] = jnp.zeros_like(ssq_ref)

            x = jnp.dot(p1_ref[...], w1_ref[...],
                        preferred_element_type=jnp.float32)      # MXU, bf16 in
            x = x + b1_ref[...]                                  # (tile_m, C1)

            # exclude tile-padding rows (>= m1) from the batch statistics
            rid = i * tile_m + jax.lax.broadcasted_iota(
                jnp.int32, (tile_m, 1), 0)
            xv = jnp.where(rid < m1, x, 0.0)
            sum_ref[...] += jnp.sum(xv, axis=0, keepdims=True)
            ssq_ref[...] += jnp.sum(xv * xv, axis=0, keepdims=True)

            start = pl.multiple_of(guard + i * tile_m, 8)
            o1_ref[pl.ds(start, tile_m), :] = x                  # stays in VMEM

        # -------- phase 1: BN normalize (at read) + 3x3 conv + bias + tanh --
        @pl.when(phase == 1)
        def _():
            @pl.when(i == 0)
            def _():
                inv_n = 1.0 / m1
                mean = sum_ref[...] * inv_n
                var = jnp.maximum(ssq_ref[...] * inv_n - mean * mean, 0.0)
                scale = gamma_ref[...] * jax.lax.rsqrt(var + BN_EPS)
                scale_ref[...] = scale
                shift_ref[...] = beta_ref[...] - mean * scale

            scale = scale_ref[...]                               # (1, C1)
            shift = shift_ref[...]                               # (1, C1)
            mvals = mask_ref[...]                                # (tile_m, 9), 0/1
            base = guard + i * tile_m

            acc = jnp.broadcast_to(b2_ref[...], (tile_m, c2p)).astype(jnp.float32)
            for t, (dh, dw) in enumerate(taps):
                delta = dh * w1_sp + dw                          # constant row shift
                src = o1_ref[pl.ds(base + delta, tile_m), :]     # (tile_m, C1) f32
                # BN at read + zero-pad mask (mask is exactly 0.0 / 1.0)
                normd = (src * scale + shift) * mvals[:, t:t + 1]
                acc = acc + jnp.dot(normd.astype(jnp.bfloat16), w2_ref[t],
                                    preferred_element_type=jnp.float32)
            o_ref[...] = jnp.tanh(acc)                           # lane-dense store

    return kernel


# ---------------------------------------------------------------------------
# Forward pass (PyTorch NCHW in / NCHW out)
# ---------------------------------------------------------------------------
def encoder_forward(x_nchw, params, *, tile_m=None):
    n, cin, h, w = x_nchw.shape
    c1 = params["w1"].shape[0]
    c2 = params["w2"].shape[0]

    kh1 = kw1 = 7
    s1, pad1 = 5, 2
    h1 = (h + 2 * pad1 - kh1) // s1 + 1
    w1s = (w + 2 * pad1 - kw1) // s1 + 1
    m1 = n * h1 * w1s
    k1 = cin * kh1 * kw1

    if tile_m is None:
        tile_m = min(512, _round_up(m1, 8))
    tile_m = max(8, _round_up(tile_m, 8))
    m1p = _round_up(m1, tile_m)
    num_tiles = m1p // tile_m
    guard = _round_up(w1s + 1, 8)        # halo for the shifted conv2 reads

    # --- conv1 im2col patches: single XLA op, feature order (c, kh, kw) -----
    patches = jax.lax.conv_general_dilated_patches(
        x_nchw, (kh1, kw1), (s1, s1), ((pad1, pad1), (pad1, pad1)))
    p1 = jnp.transpose(patches, (0, 2, 3, 1)).reshape(m1, k1)    # (M1, K1)
    p1 = jnp.pad(p1, ((0, m1p - m1), (0, 0))).astype(jnp.bfloat16)

    # --- conv1 weights (K1, C1), matching the patch feature order -----------
    w1m = jnp.transpose(params["w1"], (1, 2, 3, 0)).reshape(k1, c1)
    w1m = w1m.astype(jnp.bfloat16)
    b1 = params["b1"].reshape(1, c1).astype(jnp.float32)
    gamma = params["gamma"].reshape(1, c1).astype(jnp.float32)
    beta = params["beta"].reshape(1, c1).astype(jnp.float32)

    # --- conv2 weights as 9 (C1, C2) taps, out channels padded to 128 lanes -
    c2p = _round_up(c2, 128)
    w2t = jnp.transpose(params["w2"], (2, 3, 1, 0)).reshape(9, c1, c2)
    w2t = jnp.pad(w2t, ((0, 0), (0, 0), (0, c2p - c2))).astype(jnp.bfloat16)
    b2 = jnp.pad(params["b2"], (0, c2p - c2)).reshape(1, c2p).astype(jnp.float32)

    # --- conv2 tap-validity mask (shape-dependent only, no data) ------------
    r = jnp.arange(m1p, dtype=jnp.int32)
    hw = r % (h1 * w1s)
    hh = hw // w1s
    ww = hw % w1s
    valid_row = r < m1
    cols = []
    for dh in (-1, 0, 1):
        for dw in (-1, 0, 1):
            ok = (valid_row & (hh + dh >= 0) & (hh + dh < h1)
                  & (ww + dw >= 0) & (ww + dw < w1s))
            cols.append(ok)
    mask = jnp.stack(cols, axis=1).astype(jnp.float32)           # (M1p, 9)

    kernel = _make_fused_kernel(tile_m=tile_m, m1=m1, w1_sp=w1s,
                                c2p=c2p, guard=guard)

    # NOTE: the pre-BN conv1 intermediate (M1p x C1, f32) is held in VMEM; after
    # the /5 spatial downsample this is small for typical encoder inputs.
    out = pl.pallas_call(
        kernel,
        out_shape=jax.ShapeDtypeStruct((m1p, c2p), jnp.float32),
        grid=(2, num_tiles),                                     # (phase, m_tile)
        in_specs=[
            # patch tiles only advance in phase 0 (pinned to block 0 in phase 1,
            # so only one extra DMA at the phase transition)
            pl.BlockSpec((tile_m, k1), lambda p, i: (i * (1 - p), 0)),
            # mask tiles only advance in phase 1
            pl.BlockSpec((tile_m, 9), lambda p, i: (i * p, 0)),
            pl.BlockSpec((k1, c1), lambda p, i: (0, 0)),         # w1 (resident)
            pl.BlockSpec((1, c1), lambda p, i: (0, 0)),          # b1
            pl.BlockSpec((1, c1), lambda p, i: (0, 0)),          # gamma
            pl.BlockSpec((1, c1), lambda p, i: (0, 0)),          # beta
            pl.BlockSpec((9, c1, c2p), lambda p, i: (0, 0, 0)),  # w2 taps
            pl.BlockSpec((1, c2p), lambda p, i: (0, 0)),         # b2
        ],
        # output blocks are each written exactly once, during phase 1
        out_specs=pl.BlockSpec((tile_m, c2p), lambda p, i: (i * p, 0)),
        scratch_shapes=[
            pltpu.VMEM((m1p + 2 * guard, c1), jnp.float32),      # pre-BN conv1
            pltpu.VMEM((1, c1), jnp.float32),                    # sum
            pltpu.VMEM((1, c1), jnp.float32),                    # sum of squares
            pltpu.VMEM((1, c1), jnp.float32),                    # BN scale
            pltpu.VMEM((1, c1), jnp.float32),                    # BN shift
        ],
        compiler_params=pltpu.CompilerParams(
            dimension_semantics=("arbitrary", "arbitrary"),
            vmem_limit_bytes=64 * 1024 * 1024),
    )(p1, mask, w1m, b1, gamma, beta, w2t, b2)

    out = out[:m1, :c2].reshape(n, h1, w1s, c2)                  # drop padding
    return jnp.transpose(out, (0, 3, 1, 2))                      # NHWC -> NCHW


# ---------------------------------------------------------------------------
# Deterministic parameter init (shapes from ENCODER.__init__)
# ---------------------------------------------------------------------------
def init_params(key, in_feat_dim=3, hidden_dim=64):
    c1 = hidden_dim // 2
    c2 = hidden_dim
    ks = jax.random.split(key, 6)
    return dict(
        w1=0.05 * jax.random.normal(ks[0], (c1, in_feat_dim, 7, 7), jnp.float32),
        b1=0.05 * jax.random.normal(ks[1], (c1,), jnp.float32),
        gamma=1.0 + 0.1 * jax.random.normal(ks[2], (c1,), jnp.float32),
        beta=0.1 * jax.random.normal(ks[3], (c1,), jnp.float32),
        w2=0.05 * jax.random.normal(ks[4], (c2, c1, 3, 3), jnp.float32),
        b2=0.05 * jax.random.normal(ks[5], (c2,), jnp.float32),
    )


# ---------------------------------------------------------------------------
# Pure-JAX (XLA conv) reference for verification
# ---------------------------------------------------------------------------
def reference_forward(x_nchw, params):
    y = jax.lax.conv_general_dilated(
        x_nchw, params["w1"], window_strides=(5, 5), padding=((2, 2), (2, 2)),
        dimension_numbers=("NCHW", "OIHW", "NCHW"))
    y = y + params["b1"][None, :, None, None]
    mean = jnp.mean(y, axis=(0, 2, 3), keepdims=True)
    var = jnp.mean((y - mean) ** 2, axis=(0, 2, 3), keepdims=True)
    y = (params["gamma"][None, :, None, None] * (y - mean)
         * jax.lax.rsqrt(var + BN_EPS) + params["beta"][None, :, None, None])
    y = jax.lax.conv_general_dilated(
        y, params["w2"], window_strides=(1, 1), padding=((1, 1), (1, 1)),
        dimension_numbers=("NCHW", "OIHW", "NCHW"))
    return jnp.tanh(y + params["b2"][None, :, None, None])


if __name__ == "__main__":
    key = jax.random.PRNGKey(0)
    k_x, k_p = jax.random.split(key)
    x = jax.random.normal(k_x, (2, 3, 16, 16), jnp.float32)      # NCHW input
    params = init_params(k_p, in_feat_dim=3, hidden_dim=64)

    # tile_m=8 at this small shape exercises the multi-tile BN accumulation /
    # two-phase pipeline (grid = (2, 3)); defaults to 512-row tiles otherwise.
    fwd = jax.jit(functools.partial(encoder_forward, tile_m=8))
    out = jax.block_until_ready(fwd(x, params))
    assert out.shape == (2, 64, 3, 3), out.shape

    ref = jax.block_until_ready(reference_forward(x, params))
    assert jnp.allclose(out, ref, rtol=2e-2, atol=2e-2), (
        float(jnp.max(jnp.abs(out - ref))))

    print("KERNEL_OK")
</pallas_src>

<mosaic_0001>
module attributes {stable_mosaic.version = 11 : i64} {
  func.func @kernel(%arg0: i32, %arg1: i32, %arg2: memref<8x147xbf16, #tpu.memory_space<vmem>>, %arg3: memref<8x9xf32, #tpu.memory_space<vmem>>, %arg4: memref<147x32xbf16, #tpu.memory_space<vmem>>, %arg5: memref<1x32xf32, #tpu.memory_space<vmem>>, %arg6: memref<1x32xf32, #tpu.memory_space<vmem>>, %arg7: memref<1x32xf32, #tpu.memory_space<vmem>>, %arg8: memref<9x32x128xbf16, #tpu.memory_space<vmem>>, %arg9: memref<1x128xf32, #tpu.memory_space<vmem>>, %arg10: memref<8x128xf32, #tpu.memory_space<vmem>>, %arg11: memref<40x32xf32, #tpu.memory_space<vmem>>, %arg12: memref<1x32xf32, #tpu.memory_space<vmem>>, %arg13: memref<1x32xf32, #tpu.memory_space<vmem>>, %arg14: memref<1x32xf32, #tpu.memory_space<vmem>>, %arg15: memref<1x32xf32, #tpu.memory_space<vmem>>) attributes {dimension_semantics = [#tpu.dimension_semantics<arbitrary>, #tpu.dimension_semantics<arbitrary>], iteration_bounds = array<i64: 2, 3>, scalar_prefetch = 0 : i64, scratch_operands = 5 : i64, tpu.core_type = #tpu.core_type<tc>, window_params = [{transform_indices = @transform_0, window_bounds = array<i64: 8, 147>}, {transform_indices = @transform_1, window_bounds = array<i64: 8, 9>}, {pipeline_mode = #tpu.pipeline_mode<synchronous>, transform_indices = @transform_2, window_bounds = array<i64: 147, 32>}, {pipeline_mode = #tpu.pipeline_mode<synchronous>, transform_indices = @transform_3, window_bounds = array<i64: 1, 32>}, {pipeline_mode = #tpu.pipeline_mode<synchronous>, transform_indices = @transform_4, window_bounds = array<i64: 1, 32>}, {pipeline_mode = #tpu.pipeline_mode<synchronous>, transform_indices = @transform_5, window_bounds = array<i64: 1, 32>}, {pipeline_mode = #tpu.pipeline_mode<synchronous>, transform_indices = @transform_6, window_bounds = array<i64: 9, 32, 128>}, {pipeline_mode = #tpu.pipeline_mode<synchronous>, transform_indices = @transform_7, window_bounds = array<i64: 1, 128>}, {transform_indices = @transform_8, window_bounds = array<i64: 8, 128>}]} {
    %c0_i32 = arith.constant 0 : i32
    %0 = arith.cmpi eq, %arg0, %c0_i32 : i32
    %1 = arith.extui %0 : i1 to i32
    %c0_i32_0 = arith.constant 0 : i32
    %2 = arith.cmpi ne, %1, %c0_i32_0 : i32
    scf.if %2 {
      %c0_i32_2 = arith.constant 0 : i32
      %6 = arith.cmpi eq, %arg1, %c0_i32_2 : i32
      %7 = arith.extui %6 : i1 to i32
      %c0_i32_3 = arith.constant 0 : i32
      %8 = arith.cmpi ne, %7, %c0_i32_3 : i32
      scf.if %8 {
        %cst_23 = arith.constant 0.000000e+00 : f32
        %41 = vector.broadcast %cst_23 : f32 to vector<40x32xf32>
        %c0_24 = arith.constant 0 : index
        %c0_25 = arith.constant 0 : index
        %42 = vector.load %arg11[%c0_24, %c0_25] : memref<40x32xf32, #tpu.memory_space<vmem>>, vector<40x32xf32>
        tpu.vector_store %arg11[%c0_24, %c0_25], %41 {strides = array<i32>} : memref<40x32xf32, #tpu.memory_space<vmem>>, vector<40x32xf32>,
        %cst_26 = arith.constant 0.000000e+00 : f32
        %43 = vector.broadcast %cst_26 : f32 to vector<1x32xf32>
        %c0_27 = arith.constant 0 : index
        %c0_28 = arith.constant 0 : index
        %44 = vector.load %arg12[%c0_27, %c0_28] : memref<1x32xf32, #tpu.memory_space<vmem>>, vector<1x32xf32>
        tpu.vector_store %arg12[%c0_27, %c0_28], %43 {strides = array<i32>} : memref<1x32xf32, #tpu.memory_space<vmem>>, vector<1x32xf32>,
        %cst_29 = arith.constant 0.000000e+00 : f32
        %45 = vector.broadcast %cst_29 : f32 to vector<1x32xf32>
        %c0_30 = arith.constant 0 : index
        %c0_31 = arith.constant 0 : index
        %46 = vector.load %arg13[%c0_30, %c0_31] : memref<1x32xf32, #tpu.memory_space<vmem>>, vector<1x32xf32>
        tpu.vector_store %arg13[%c0_30, %c0_31], %45 {strides = array<i32>} : memref<1x32xf32, #tpu.memory_space<vmem>>, vector<1x32xf32>,
      } else {
      }
      %c0 = arith.constant 0 : index
      %c0_4 = arith.constant 0 : index
      %9 = vector.load %arg2[%c0, %c0_4] : memref<8x147xbf16, #tpu.memory_space<vmem>>, vector<8x147xbf16>
      %c0_5 = arith.constant 0 : index
      %c0_6 = arith.constant 0 : index
      %10 = vector.load %arg4[%c0_5, %c0_6] : memref<147x32xbf16, #tpu.memory_space<vmem>>, vector<147x32xbf16>
      %cst = arith.constant dense<0.000000e+00> : vector<8x32xf32>
      %11 = tpu.matmul %9, %10, %cst {dimension_numbers = #tpu.dot_dimension_numbers<[1], [0], [0], [1], [0, 0, 1, 1], [], []>} : vector<8x147xbf16>, vector<147x32xbf16>, vector<8x32xf32> -> vector<8x32xf32>
      %c0_7 = arith.constant 0 : index
      %c0_8 = arith.constant 0 : index
      %12 = vector.load %arg5[%c0_7, %c0_8] : memref<1x32xf32, #tpu.memory_space<vmem>>, vector<1x32xf32>
      %13 = vector.broadcast %12 : vector<1x32xf32> to vector<8x32xf32>
      %14 = arith.addf %11, %13 : vector<8x32xf32>
      %c8_i32 = arith.constant 8 : i32
      %15 = arith.muli %arg1, %c8_i32 : i32
      %16 = tpu.iota {dimensions = array<i32: 0>} : vector<8x1xi32>
      %17 = vector.broadcast %15 : i32 to vector<8x1xi32>
      %18 = arith.addi %17, %16 : vector<8x1xi32>
      %c18_i32 = arith.constant 18 : i32
      %19 = vector.broadcast %c18_i32 : i32 to vector<8x1xi32>
      %20 = arith.cmpi slt, %18, %19 : vector<8x1xi32>
      %cst_9 = arith.constant 0.000000e+00 : f32
      %21 = vector.shape_cast %20 : vector<8x1xi1> to vector<8x1xi1>
      %22 = vector.broadcast %21 : vector<8x1xi1> to vector<8x32xi1>
      %23 = vector.broadcast %cst_9 : f32 to vector<8x32xf32>
      %24 = arith.select %22, %14, %23 : vector<8x32xi1>, vector<8x32xf32>
      %c0_10 = arith.constant 0 : index
      %c0_11 = arith.constant 0 : index
      %25 = vector.load %arg12[%c0_10, %c0_11] : memref<1x32xf32, #tpu.memory_space<vmem>>, vector<1x32xf32>
      %cst_12 = arith.constant dense<0.000000e+00> : vector<32xf32>
      %26 = vector.multi_reduction <add>, %24, %cst_12 [0] : vector<8x32xf32> to vector<32xf32>
      %27 = vector.shape_cast %26 : vector<32xf32> to vector<1x32xf32>
      %28 = arith.addf %25, %27 : vector<1x32xf32>
      %c0_13 = arith.constant 0 : index
      %c0_14 = arith.constant 0 : index
      %29 = vector.load %arg12[%c0_13, %c0_14] : memref<1x32xf32, #tpu.memory_space<vmem>>, vector<1x32xf32>
      tpu.vector_store %arg12[%c0_13, %c0_14], %28 {strides = array<i32>} : memref<1x32xf32, #tpu.memory_space<vmem>>, vector<1x32xf32>,
      %c0_15 = arith.constant 0 : index
      %c0_16 = arith.constant 0 : index
      %30 = vector.load %arg13[%c0_15, %c0_16] : memref<1x32xf32, #tpu.memory_space<vmem>>, vector<1x32xf32>
      %31 = arith.mulf %24, %24 : vector<8x32xf32>
      %cst_17 = arith.constant dense<0.000000e+00> : vector<32xf32>
      %32 = vector.multi_reduction <add>, %31, %cst_17 [0] : vector<8x32xf32> to vector<32xf32>
      %33 = vector.shape_cast %32 : vector<32xf32> to vector<1x32xf32>
      %34 = arith.addf %30, %33 : vector<1x32xf32>
      %c0_18 = arith.constant 0 : index
      %c0_19 = arith.constant 0 : index
      %35 = vector.load %arg13[%c0_18, %c0_19] : memref<1x32xf32, #tpu.memory_space<vmem>>, vector<1x32xf32>
      tpu.vector_store %arg13[%c0_18, %c0_19], %34 {strides = array<i32>} : memref<1x32xf32, #tpu.memory_space<vmem>>, vector<1x32xf32>,
      %c8_i32_20 = arith.constant 8 : i32
      %36 = arith.muli %arg1, %c8_i32_20 : i32
      %c8_i32_21 = arith.constant 8 : i32
      %37 = arith.addi %c8_i32_21, %36 : i32
      %38 = tpu.assume_multiple %37, 8 : i32
      %39 = arith.index_cast %38 : i32 to index
      %c0_22 = arith.constant 0 : index
      %40 = vector.load %arg11[%39, %c0_22] : memref<40x32xf32, #tpu.memory_space<vmem>>, vector<8x32xf32>
      tpu.vector_store %arg11[%39, %c0_22], %14 {strides = array<i32>} : memref<40x32xf32, #tpu.memory_space<vmem>>, vector<8x32xf32>,
    } else {
    }
    %c1_i32 = arith.constant 1 : i32
    %3 = arith.cmpi eq, %arg0, %c1_i32 : i32
    %4 = arith.extui %3 : i1 to i32
    %c0_i32_1 = arith.constant 0 : i32
    %5 = arith.cmpi ne, %4, %c0_i32_1 : i32
    scf.if %5 {
      %c0_i32_2 = arith.constant 0 : i32
      %6 = arith.cmpi eq, %arg1, %c0_i32_2 : i32
      %7 = arith.extui %6 : i1 to i32
      %c0_i32_3 = arith.constant 0 : i32
      %8 = arith.cmpi ne, %7, %c0_i32_3 : i32
      scf.if %8 {
        %c0_52 = arith.constant 0 : index
        %c0_53 = arith.constant 0 : index
        %154 = vector.load %arg12[%c0_52, %c0_53] : memref<1x32xf32, #tpu.memory_space<vmem>>, vector<1x32xf32>
        %cst_54 = arith.constant 0.055555556 : f32
        %155 = vector.broadcast %cst_54 : f32 to vector<1x32xf32>
        %156 = arith.mulf %154, %155 : vector<1x32xf32>
        %c0_55 = arith.constant 0 : index
        %c0_56 = arith.constant 0 : index
        %157 = vector.load %arg13[%c0_55, %c0_56] : memref<1x32xf32, #tpu.memory_space<vmem>>, vector<1x32xf32>
        %cst_57 = arith.constant 0.055555556 : f32
        %158 = vector.broadcast %cst_57 : f32 to vector<1x32xf32>
        %159 = arith.mulf %157, %158 : vector<1x32xf32>
        %160 = arith.mulf %156, %156 : vector<1x32xf32>
        %161 = arith.subf %159, %160 : vector<1x32xf32>
        %cst_58 = arith.constant 0.000000e+00 : f32
        %162 = vector.broadcast %cst_58 : f32 to vector<1x32xf32>
        %163 = arith.maximumf %161, %162 : vector<1x32xf32>
        %c0_59 = arith.constant 0 : index
        %c0_60 = arith.constant 0 : index
        %164 = vector.load %arg6[%c0_59, %c0_60] : memref<1x32xf32, #tpu.memory_space<vmem>>, vector<1x32xf32>
        %cst_61 = arith.constant 9.99999974E-6 : f32
        %165 = vector.broadcast %cst_61 : f32 to vector<1x32xf32>
        %166 = arith.addf %163, %165 : vector<1x32xf32>
        %167 = math.rsqrt %166 : vector<1x32xf32>
        %168 = arith.mulf %164, %167 : vector<1x32xf32>
        %c0_62 = arith.constant 0 : index
        %c0_63 = arith.constant 0 : index
        %169 = vector.load %arg14[%c0_62, %c0_63] : memref<1x32xf32, #tpu.memory_space<vmem>>, vector<1x32xf32>
        tpu.vector_store %arg14[%c0_62, %c0_63], %168 {strides = array<i32>} : memref<1x32xf32, #tpu.memory_space<vmem>>, vector<1x32xf32>,
        %c0_64 = arith.constant 0 : index
        %c0_65 = arith.constant 0 : index
        %170 = vector.load %arg7[%c0_64, %c0_65] : memref<1x32xf32, #tpu.memory_space<vmem>>, vector<1x32xf32>
        %171 = arith.mulf %156, %168 : vector<1x32xf32>
        %172 = arith.subf %170, %171 : vector<1x32xf32>
        %c0_66 = arith.constant 0 : index
        %c0_67 = arith.constant 0 : index
        %173 = vector.load %arg15[%c0_66, %c0_67] : memref<1x32xf32, #tpu.memory_space<vmem>>, vector<1x32xf32>
        tpu.vector_store %arg15[%c0_66, %c0_67], %172 {strides = array<i32>} : memref<1x32xf32, #tpu.memory_space<vmem>>, vector<1x32xf32>,
      } else {
      }
      %c0 = arith.constant 0 : index
      %c0_4 = arith.constant 0 : index
      %9 = vector.load %arg14[%c0, %c0_4] : memref<1x32xf32, #tpu.memory_space<vmem>>, vector<1x32xf32>
      %c0_5 = arith.constant 0 : index
      %c0_6 = arith.constant 0 : index
      %10 = vector.load %arg15[%c0_5, %c0_6] : memref<1x32xf32, #tpu.memory_space<vmem>>, vector<1x32xf32>
      %c0_7 = arith.constant 0 : index
      %c0_8 = arith.constant 0 : index
      %11 = vector.load %arg3[%c0_7, %c0_8] : memref<8x9xf32, #tpu.memory_space<vmem>>, vector<8x9xf32>
      %c8_i32 = arith.constant 8 : i32
      %12 = arith.muli %arg1, %c8_i32 : i32
      %c8_i32_9 = arith.constant 8 : i32
      %13 = arith.addi %c8_i32_9, %12 : i32
      %c0_10 = arith.constant 0 : index
      %c0_11 = arith.constant 0 : index
      %14 = vector.load %arg9[%c0_10, %c0_11] : memref<1x128xf32, #tpu.memory_space<vmem>>, vector<1x128xf32>
      %15 = vector.shape_cast %14 : vector<1x128xf32> to vector<1x128xf32>
      %16 = vector.broadcast %15 : vector<1x128xf32> to vector<8x128xf32>
      %c-4_i32 = arith.constant -4 : i32
      %17 = arith.addi %13, %c-4_i32 : i32
      %18 = arith.index_cast %17 : i32 to index
      %c0_12 = arith.constant 0 : index
      %19 = vector.load %arg11[%18, %c0_12] : memref<40x32xf32, #tpu.memory_space<vmem>>, vector<8x32xf32>
      %20 = vector.broadcast %9 : vector<1x32xf32> to vector<8x32xf32>
      %21 = arith.mulf %19, %20 : vector<8x32xf32>
      %22 = vector.broadcast %10 : vector<1x32xf32> to vector<8x32xf32>
      %23 = arith.addf %21, %22 : vector<8x32xf32>
      %24 = vector.extract_strided_slice %11 {offsets = [0, 0], sizes = [8, 1], strides = [1, 1]} : vector<8x9xf32> to vector<8x1xf32>
      %25 = vector.broadcast %24 : vector<8x1xf32> to vector<8x32xf32>
      %26 = arith.mulf %23, %25 : vector<8x32xf32>
      %27 = arith.truncf %26 : vector<8x32xf32> to vector<8x32xbf16>
      %c0_13 = arith.constant 0 : index
      %c0_14 = arith.constant 0 : index
      %c0_15 = arith.constant 0 : index
      %28 = vector.load %arg8[%c0_13, %c0_14, %c0_15] : memref<9x32x128xbf16, #tpu.memory_space<vmem>>, vector<1x32x128xbf16>
      %29 = vector.shape_cast %28 : vector<1x32x128xbf16> to vector<32x128xbf16>
      %cst = arith.constant dense<0.000000e+00> : vector<8x128xf32>
      %30 = tpu.matmul %27, %29, %cst {dimension_numbers = #tpu.dot_dimension_numbers<[1], [0], [0], [1], [0, 0, 1, 1], [], []>} : vector<8x32xbf16>, vector<32x128xbf16>, vector<8x128xf32> -> vector<8x128xf32>
      %31 = arith.addf %16, %30 : vector<8x128xf32>
      %c-3_i32 = arith.constant -3 : i32
      %32 = arith.addi %13, %c-3_i32 : i32
      %33 = arith.index_cast %32 : i32 to index
      %c0_16 = arith.constant 0 : index
      %34 = vector.load %arg11[%33, %c0_16] : memref<40x32xf32, #tpu.memory_space<vmem>>, vector<8x32xf32>
      %35 = vector.broadcast %9 : vector<1x32xf32> to vector<8x32xf32>
      %36 = arith.mulf %34, %35 : vector<8x32xf32>
      %37 = vector.broadcast %10 : vector<1x32xf32> to vector<8x32xf32>
      %38 = arith.addf %36, %37 : vector<8x32xf32>
      %39 = vector.extract_strided_slice %11 {offsets = [0, 1], sizes = [8, 1], strides = [1, 1]} : vector<8x9xf32> to vector<8x1xf32>
      %40 = vector.broadcast %39 : vector<8x1xf32> to vector<8x32xf32>
      %41 = arith.mulf %38, %40 : vector<8x32xf32>
      %42 = arith.truncf %41 : vector<8x32xf32> to vector<8x32xbf16>
      %c1 = arith.constant 1 : index
      %c0_17 = arith.constant 0 : index
      %c0_18 = arith.constant 0 : index
      %43 = vector.load %arg8[%c1, %c0_17, %c0_18] : memref<9x32x128xbf16, #tpu.memory_space<vmem>>, vector<1x32x128xbf16>
      %44 = vector.shape_cast %43 : vector<1x32x128xbf16> to vector<32x128xbf16>
      %cst_19 = arith.constant dense<0.000000e+00> : vector<8x128xf32>
      %45 = tpu.matmul %42, %44, %cst_19 {dimension_numbers = #tpu.dot_dimension_numbers<[1], [0], [0], [1], [0, 0, 1, 1], [], []>} : vector<8x32xbf16>, vector<32x128xbf16>, vector<8x128xf32> -> vector<8x128xf32>
      %46 = arith.addf %31, %45 : vector<8x128xf32>
      %c-2_i32 = arith.constant -2 : i32
      %47 = arith.addi %13, %c-2_i32 : i32
      %48 = arith.index_cast %47 : i32 to index
      %c0_20 = arith.constant 0 : index
      %49 = vector.load %arg11[%48, %c0_20] : memref<40x32xf32, #tpu.memory_space<vmem>>, vector<8x32xf32>
      %50 = vector.broadcast %9 : vector<1x32xf32> to vector<8x32xf32>
      %51 = arith.mulf %49, %50 : vector<8x32xf32>
      %52 = vector.broadcast %10 : vector<1x32xf32> to vector<8x32xf32>
      %53 = arith.addf %51, %52 : vector<8x32xf32>
      %54 = vector.extract_strided_slice %11 {offsets = [0, 2], sizes = [8, 1], strides = [1, 1]} : vector<8x9xf32> to vector<8x1xf32>
      %55 = vector.broadcast %54 : vector<8x1xf32> to vector<8x32xf32>
      %56 = arith.mulf %53, %55 : vector<8x32xf32>
      %57 = arith.truncf %56 : vector<8x32xf32> to vector<8x32xbf16>
      %c2 = arith.constant 2 : index
      %c0_21 = arith.constant 0 : index
      %c0_22 = arith.constant 0 : index
      %58 = vector.load %arg8[%c2, %c0_21, %c0_22] : memref<9x32x128xbf16, #tpu.memory_space<vmem>>, vector<1x32x128xbf16>
      %59 = vector.shape_cast %58 : vector<1x32x128xbf16> to vector<32x128xbf16>
      %cst_23 = arith.constant dense<0.000000e+00> : vector<8x128xf32>
      %60 = tpu.matmul %57, %59, %cst_23 {dimension_numbers = #tpu.dot_dimension_numbers<[1], [0], [0], [1], [0, 0, 1, 1], [], []>} : vector<8x32xbf16>, vector<32x128xbf16>, vector<8x128xf32> -> vector<8x128xf32>
      %61 = arith.addf %46, %60 : vector<8x128xf32>
      %c-1_i32 = arith.constant -1 : i32
      %62 = arith.addi %13, %c-1_i32 : i32
      %63 = arith.index_cast %62 : i32 to index
      %c0_24 = arith.constant 0 : index
      %64 = vector.load %arg11[%63, %c0_24] : memref<40x32xf32, #tpu.memory_space<vmem>>, vector<8x32xf32>
      %65 = vector.broadcast %9 : vector<1x32xf32> to vector<8x32xf32>
      %66 = arith.mulf %64, %65 : vector<8x32xf32>
      %67 = vector.broadcast %10 : vector<1x32xf32> to vector<8x32xf32>
      %68 = arith.addf %66, %67 : vector<8x32xf32>
      %69 = vector.extract_strided_slice %11 {offsets = [0, 3], sizes = [8, 1], strides = [1, 1]} : vector<8x9xf32> to vector<8x1xf32>
      %70 = vector.broadcast %69 : vector<8x1xf32> to vector<8x32xf32>
      %71 = arith.mulf %68, %70 : vector<8x32xf32>
      %72 = arith.truncf %71 : vector<8x32xf32> to vector<8x32xbf16>
      %c3 = arith.constant 3 : index
      %c0_25 = arith.constant 0 : index
      %c0_26 = arith.constant 0 : index
      %73 = vector.load %arg8[%c3, %c0_25, %c0_26] : memref<9x32x128xbf16, #tpu.memory_space<vmem>>, vector<1x32x128xbf16>
      %74 = vector.shape_cast %73 : vector<1x32x128xbf16> to vector<32x128xbf16>
      %cst_27 = arith.constant dense<0.000000e+00> : vector<8x128xf32>
      %75 = tpu.matmul %72, %74, %cst_27 {dimension_numbers = #tpu.dot_dimension_numbers<[1], [0], [0], [1], [0, 0, 1, 1], [], []>} : vector<8x32xbf16>, vector<32x128xbf16>, vector<8x128xf32> -> vector<8x128xf32>
      %76 = arith.addf %61, %75 : vector<8x128xf32>
      %c0_i32_28 = arith.constant 0 : i32
      %77 = arith.addi %13, %c0_i32_28 : i32
      %78 = arith.index_cast %77 : i32 to index
      %c0_29 = arith.constant 0 : index
      %79 = vector.load %arg11[%78, %c0_29] : memref<40x32xf32, #tpu.memory_space<vmem>>, vector<8x32xf32>
      %80 = vector.broadcast %9 : vector<1x32xf32> to vector<8x32xf32>
      %81 = arith.mulf %79, %80 : vector<8x32xf32>
      %82 = vector.broadcast %10 : vector<1x32xf32> to vector<8x32xf32>
      %83 = arith.addf %81, %82 : vector<8x32xf32>
      %84 = vector.extract_strided_slice %11 {offsets = [0, 4], sizes = [8, 1], strides = [1, 1]} : vector<8x9xf32> to vector<8x1xf32>
      %85 = vector.broadcast %84 : vector<8x1xf32> to vector<8x32xf32>
      %86 = arith.mulf %83, %85 : vector<8x32xf32>
      %87 = arith.truncf %86 : vector<8x32xf32> to vector<8x32xbf16>
      %c4 = arith.constant 4 : index
      %c0_30 = arith.constant 0 : index
      %c0_31 = arith.constant 0 : index
      %88 = vector.load %arg8[%c4, %c0_30, %c0_31] : memref<9x32x128xbf16, #tpu.memory_space<vmem>>, vector<1x32x128xbf16>
      %89 = vector.shape_cast %88 : vector<1x32x128xbf16> to vector<32x128xbf16>
      %cst_32 = arith.constant dense<0.000000e+00> : vector<8x128xf32>
      %90 = tpu.matmul %87, %89, %cst_32 {dimension_numbers = #tpu.dot_dimension_numbers<[1], [0], [0], [1], [0, 0, 1, 1], [], []>} : vector<8x32xbf16>, vector<32x128xbf16>, vector<8x128xf32> -> vector<8x128xf32>
      %91 = arith.addf %76, %90 : vector<8x128xf32>
      %c1_i32_33 = arith.constant 1 : i32
      %92 = arith.addi %13, %c1_i32_33 : i32
      %93 = arith.index_cast %92 : i32 to index
      %c0_34 = arith.constant 0 : index
      %94 = vector.load %arg11[%93, %c0_34] : memref<40x32xf32, #tpu.memory_space<vmem>>, vector<8x32xf32>
      %95 = vector.broadcast %9 : vector<1x32xf32> to vector<8x32xf32>
      %96 = arith.mulf %94, %95 : vector<8x32xf32>
      %97 = vector.broadcast %10 : vector<1x32xf32> to vector<8x32xf32>
      %98 = arith.addf %96, %97 : vector<8x32xf32>
      %99 = vector.extract_strided_slice %11 {offsets = [0, 5], sizes = [8, 1], strides = [1, 1]} : vector<8x9xf32> to vector<8x1xf32>
      %100 = vector.broadcast %99 : vector<8x1xf32> to vector<8x32xf32>
      %101 = arith.mulf %98, %100 : vector<8x32xf32>
      %102 = arith.truncf %101 : vector<8x32xf32> to vector<8x32xbf16>
      %c5 = arith.constant 5 : index
      %c0_35 = arith.constant 0 : index
      %c0_36 = arith.constant 0 : index
      %103 = vector.load %arg8[%c5, %c0_35, %c0_36] : memref<9x32x128xbf16, #tpu.memory_space<vmem>>, vector<1x32x128xbf16>
      %104 = vector.shape_cast %103 : vector<1x32x128xbf16> to vector<32x128xbf16>
      %cst_37 = arith.constant dense<0.000000e+00> : vector<8x128xf32>
      %105 = tpu.matmul %102, %104, %cst_37 {dimension_numbers = #tpu.dot_dimension_numbers<[1], [0], [0], [1], [0, 0, 1, 1], [], []>} : vector<8x32xbf16>, vector<32x128xbf16>, vector<8x128xf32> -> vector<8x128xf32>
      %106 = arith.addf %91, %105 : vector<8x128xf32>
      %c2_i32 = arith.constant 2 : i32
      %107 = arith.addi %13, %c2_i32 : i32
      %108 = arith.index_cast %107 : i32 to index
      %c0_38 = arith.constant 0 : index
      %109 = vector.load %arg11[%108, %c0_38] : memref<40x32xf32, #tpu.memory_space<vmem>>, vector<8x32xf32>
      %110 = vector.broadcast %9 : vector<1x32xf32> to vector<8x32xf32>
      %111 = arith.mulf %109, %110 : vector<8x32xf32>
      %112 = vector.broadcast %10 : vector<1x32xf32> to vector<8x32xf32>
      %113 = arith.addf %111, %112 : vector<8x32xf32>
      %114 = vector.extract_strided_slice %11 {offsets = [0, 6], sizes = [8, 1], strides = [1, 1]} : vector<8x9xf32> to vector<8x1xf32>
      %115 = vector.broadcast %114 : vector<8x1xf32> to vector<8x32xf32>
      %116 = arith.mulf %113, %115 : vector<8x32xf32>
      %117 = arith.truncf %116 : vector<8x32xf32> to vector<8x32xbf16>
      %c6 = arith.constant 6 : index
      %c0_39 = arith.constant 0 : index
      %c0_40 = arith.constant 0 : index
      %118 = vector.load %arg8[%c6, %c0_39, %c0_40] : memref<9x32x128xbf16, #tpu.memory_space<vmem>>, vector<1x32x128xbf16>
      %119 = vector.shape_cast %118 : vector<1x32x128xbf16> to vector<32x128xbf16>
      %cst_41 = arith.constant dense<0.000000e+00> : vector<8x128xf32>
      %120 = tpu.matmul %117, %119, %cst_41 {dimension_numbers = #tpu.dot_dimension_numbers<[1], [0], [0], [1], [0, 0, 1, 1], [], []>} : vector<8x32xbf16>, vector<32x128xbf16>, vector<8x128xf32> -> vector<8x128xf32>
      %121 = arith.addf %106, %120 : vector<8x128xf32>
      %c3_i32 = arith.constant 3 : i32
      %122 = arith.addi %13, %c3_i32 : i32
      %123 = arith.index_cast %122 : i32 to index
      %c0_42 = arith.constant 0 : index
      %124 = vector.load %arg11[%123, %c0_42] : memref<40x32xf32, #tpu.memory_space<vmem>>, vector<8x32xf32>
      %125 = vector.broadcast %9 : vector<1x32xf32> to vector<8x32xf32>
      %126 = arith.mulf %124, %125 : vector<8x32xf32>
      %127 = vector.broadcast %10 : vector<1x32xf32> to vector<8x32xf32>
      %128 = arith.addf %126, %127 : vector<8x32xf32>
      %129 = vector.extract_strided_slice %11 {offsets = [0, 7], sizes = [8, 1], strides = [1, 1]} : vector<8x9xf32> to vector<8x1xf32>
      %130 = vector.broadcast %129 : vector<8x1xf32> to vector<8x32xf32>
      %131 = arith.mulf %128, %130 : vector<8x32xf32>
      %132 = arith.truncf %131 : vector<8x32xf32> to vector<8x32xbf16>
      %c7 = arith.constant 7 : index
      %c0_43 = arith.constant 0 : index
      %c0_44 = arith.constant 0 : index
      %133 = vector.load %arg8[%c7, %c0_43, %c0_44] : memref<9x32x128xbf16, #tpu.memory_space<vmem>>, vector<1x32x128xbf16>
      %134 = vector.shape_cast %133 : vector<1x32x128xbf16> to vector<32x128xbf16>
      %cst_45 = arith.constant dense<0.000000e+00> : vector<8x128xf32>
      %135 = tpu.matmul %132, %134, %cst_45 {dimension_numbers = #tpu.dot_dimension_numbers<[1], [0], [0], [1], [0, 0, 1, 1], [], []>} : vector<8x32xbf16>, vector<32x128xbf16>, vector<8x128xf32> -> vector<8x128xf32>
      %136 = arith.addf %121, %135 : vector<8x128xf32>
      %c4_i32 = arith.constant 4 : i32
      %137 = arith.addi %13, %c4_i32 : i32
      %138 = arith.index_cast %137 : i32 to index
      %c0_46 = arith.constant 0 : index
      %139 = vector.load %arg11[%138, %c0_46] : memref<40x32xf32, #tpu.memory_space<vmem>>, vector<8x32xf32>
      %140 = vector.broadcast %9 : vector<1x32xf32> to vector<8x32xf32>
      %141 = arith.mulf %139, %140 : vector<8x32xf32>
      %142 = vector.broadcast %10 : vector<1x32xf32> to vector<8x32xf32>
      %143 = arith.addf %141, %142 : vector<8x32xf32>
      %144 = vector.extract_strided_slice %11 {offsets = [0, 8], sizes = [8, 1], strides = [1, 1]} : vector<8x9xf32> to vector<8x1xf32>
      %145 = vector.broadcast %144 : vector<8x1xf32> to vector<8x32xf32>
      %146 = arith.mulf %143, %145 : vector<8x32xf32>
      %147 = arith.truncf %146 : vector<8x32xf32> to vector<8x32xbf16>
      %c8 = arith.constant 8 : index
      %c0_47 = arith.constant 0 : index
      %c0_48 = arith.constant 0 : index
      %148 = vector.load %arg8[%c8, %c0_47, %c0_48] : memref<9x32x128xbf16, #tpu.memory_space<vmem>>, vector<1x32x128xbf16>
      %149 = vector.shape_cast %148 : vector<1x32x128xbf16> to vector<32x128xbf16>
      %cst_49 = arith.constant dense<0.000000e+00> : vector<8x128xf32>
      %150 = tpu.matmul %147, %149, %cst_49 {dimension_numbers = #tpu.dot_dimension_numbers<[1], [0], [0], [1], [0, 0, 1, 1], [], []>} : vector<8x32xbf16>, vector<32x128xbf16>, vector<8x128xf32> -> vector<8x128xf32>
      %151 = arith.addf %136, %150 : vector<8x128xf32>
      %152 = math.tanh %151 : vector<8x128xf32>
      %c0_50 = arith.constant 0 : index
      %c0_51 = arith.constant 0 : index
      %153 = vector.load %arg10[%c0_50, %c0_51] : memref<8x128xf32, #tpu.memory_space<vmem>>, vector<8x128xf32>
      tpu.vector_store %arg10[%c0_50, %c0_51], %152 {strides = array<i32>} : memref<8x128xf32, #tpu.memory_space<vmem>>, vector<8x128xf32>,
    } else {
    }
    return
  }
  func.func @transform_0(%arg0: i32, %arg1: i32) -> (i32, i32) {
    %c1_i32 = arith.constant 1 : i32
    %0 = arith.subi %c1_i32, %arg0 : i32
    %1 = arith.muli %arg1, %0 : i32
    %c0_i32 = arith.constant 0 : i32
    %c0_i32_0 = arith.constant 0 : i32
    return %1, %c0_i32 : i32, i32
  }
  func.func @transform_1(%arg0: i32, %arg1: i32) -> (i32, i32) {
    %0 = arith.muli %arg1, %arg0 : i32
    %c0_i32 = arith.constant 0 : i32
    %c0_i32_0 = arith.constant 0 : i32
    return %0, %c0_i32 : i32, i32
  }
  func.func @transform_2(%arg0: i32, %arg1: i32) -> (i32, i32) {
    %c0_i32 = arith.constant 0 : i32
    %c0_i32_0 = arith.constant 0 : i32
    %c0_i32_1 = arith.constant 0 : i32
    return %c0_i32, %c0_i32_0 : i32, i32
  }
  func.func @transform_3(%arg0: i32, %arg1: i32) -> (i32, i32) {
    %c0_i32 = arith.constant 0 : i32
    %c0_i32_0 = arith.constant 0 : i32
    %c0_i32_1 = arith.constant 0 : i32
    return %c0_i32, %c0_i32_0 : i32, i32
  }
  func.func @transform_4(%arg0: i32, %arg1: i32) -> (i32, i32) {
    %c0_i32 = arith.constant 0 : i32
    %c0_i32_0 = arith.constant 0 : i32
    %c0_i32_1 = arith.constant 0 : i32
    return %c0_i32, %c0_i32_0 : i32, i32
  }
  func.func @transform_5(%arg0: i32, %arg1: i32) -> (i32, i32) {
    %c0_i32 = arith.constant 0 : i32
    %c0_i32_0 = arith.constant 0 : i32
    %c0_i32_1 = arith.constant 0 : i32
    return %c0_i32, %c0_i32_0 : i32, i32
  }
  func.func @transform_6(%arg0: i32, %arg1: i32) -> (i32, i32, i32) {
    %c0_i32 = arith.constant 0 : i32
    %c0_i32_0 = arith.constant 0 : i32
    %c0_i32_1 = arith.constant 0 : i32
    %c0_i32_2 = arith.constant 0 : i32
    return %c0_i32, %c0_i32_0, %c0_i32_1 : i32, i32, i32
  }
  func.func @transform_7(%arg0: i32, %arg1: i32) -> (i32, i32) {
    %c0_i32 = arith.constant 0 : i32
    %c0_i32_0 = arith.constant 0 : i32
    %c0_i32_1 = arith.constant 0 : i32
    return %c0_i32, %c0_i32_0 : i32, i32
  }
  func.func @transform_8(%arg0: i32, %arg1: i32) -> (i32, i32) {
    %0 = arith.muli %arg1, %arg0 : i32
    %c0_i32 = arith.constant 0 : i32
    %c0_i32_0 = arith.constant 0 : i32
    return %0, %c0_i32 : i32, i32
  }
}

</mosaic_0001>

<bundles_post_ra>
// kernel: encoder_forward.1
= control target key start
LH: loop header
LB: loop body
LE: loop exit
PB: predicated region body
PF: predicated region fallthrough
CT: control target
= control target key end

     0   :  { %s1770_s27 = smov 0   ;;  %s1772_s28 = smov 0   ;;  %s2018_s0 = inlined_call_operand.vmem [shape: bf16[24,147], index: 0, kind: input, shape index: {}]   ;;  %s2019_s1 = inlined_call_operand.vmem [shape: f32[24,9], index: 1, kind: input, shape index: {}]   ;;  %s2020_s2 = inlined_call_operand.vmem [shape: bf16[147,32], index: 2, kind: input, shape index: {}]   ;;  %s2021_s3 = inlined_call_operand.vmem [shape: f32[1,32], index: 3, kind: input, shape index: {}]   ;;  %s2022_s4 = inlined_call_operand.vmem [shape: f32[1,32], index: 4, kind: input, shape index: {}]   ;;  %s2023_s5 = inlined_call_operand.vmem [shape: f32[1,32], index: 5, kind: input, shape index: {}]   ;;  %s2024_s6 = inlined_call_operand.vmem [shape: bf16[9,32,128], index: 6, kind: input, shape index: {}]   ;;  %s2025_s7 = inlined_call_operand.vmem [shape: f32[1,128], index: 7, kind: input, shape index: {}]   ;;  %s2026_s8 = inlined_call_operand.vmem [shape: f32[24,128], index: 8, kind: output, shape index: {}]  }
   0x1   :  { %s1774_s29 = smov 0   ;;  %s1776_s30 = smov 0  }
   0x2   :  { %s1778_s9 = smov 0  }
   0x3 LB: > { %s27_s10 = sadd.s32 1, %s1701_s29  ;;  %s30_s11 = sadd.s32 1, %s1705_s30  ;;  %s1709_s9 = sphi %s1778_s9, %s18_s9   ;;  %s1705_s30 = sphi %s1776_s30, %s2030_s30   ;;  %s1701_s29 = sphi %s1774_s29, %s2029_s29   ;;  %s1697_s28 = sphi %s1772_s28, %s2028_s28   ;;  %s1693_s27 = sphi %s1770_s27, %s2027_s27  }
   0x4   : > { %p28_p0 = scmp.ge.s32.totalorder %s27_s10, 3  ;;  %p1366_p1 = scmp.ge.s32.totalorder %s1709_s9, 1 }
   0x5   : > { %p297_p2 = scmp.lt.s32.totalorder %s1709_s9, 7 }
   0x6   : > { %s2032_s10 = smov (%p28_p0, %s27_s10), 0  ;;  %s2034_s11 = smov (!%p28_p0, %s30_s11), %s1705_s30 }
   0x7   : > { %p298_p3 = pnand %p1366_p1, %p297_p2  ;;  %p32_p4 = scmp.ge.s32.totalorder %s2034_s11, 2 }
   0x8   : > { %s338_s12 = ssub.s32 (!%p298_p3), 1, %s1697_s28  ;;  %s347_s13 = smul.u32 (!%p298_p3), %s1693_s27, %s1697_s28 }
   0x9   : > { %s2036_s11 = smov (%p32_p4, %s2034_s11), 0  ;;  %301 = sbr.rel (%p298_p3) target bundleno = 703 (0x2bf), region = 52 }
   0xa   : > { %s339_s14 = smul.u32 (!%p298_p3), %s1693_s27, %s338_s12  ;;  %p348_p5 = scmp.lt.s32.totalorder (!%p298_p3), %s347_s13, 2 }
   0xb   : > { %p1371_p7 = scmp.ne.s32.totalorder (!%p298_p3), %s1697_s28, 0 }
   0xc   : > { %p340_p6 = scmp.lt.s32.totalorder (!%p298_p3), %s339_s14, 2 }
   0xe   : > { %s2038_s13 = smov (!%p348_p5, %s347_s13), 2  ;;  %s2040_s14 = smov (!%p340_p6, %s339_s14), 2 }
   0xf   : > { %s1369_s15 = sshll.u32 %s2038_s13, 3  ;;  %s1474_s16 = sshll.u32 %s2040_s14, 3 }
  0x10   : > { %s1811_s19 = scalar_lea.vmem %s2019_s1, %s1369_s15  ;;  %s344_s22 = scalar_lea.vmem %s2018_s0, %s1474_s16 }
  0x11   : > { %s1819_s25 = scalar_lea.vmem %s2026_s8, %s1369_s15  ;;  %363 = sbr.rel (%p1371_p7) target bundleno = 287 (0x11f), region = 56 }
  0x12   : > { %p1372_p8 = scmp.ne.s32.totalorder (!%p1371_p7), %s1693_s27, 0 }
  0x16   : > { %367 = sbr.rel (%p1372_p8) target bundleno = 32 (0x20), region = 60 }
  0x1b   : > { %vm368_vm0 = vcmask 261120   ;;  %vm374_vm1 = vcmask 253952   ;;  %v1711_v0 = vmov 0.0  }
  0x1c   : > { %369 = vst.msk [vmem:[#allocation2] sm:$0xff] %vm368_vm0, %v1711_v0  ;;  %370 = vst.msk [vmem:[#allocation2 + $0x8] sm:$0xff] %vm368_vm0, %v1711_v0 }
  0x1d   : > { %371 = vst.msk [vmem:[#allocation2 + $0x10] sm:$0xff] %vm368_vm0, %v1711_v0  ;;  %372 = vst.msk [vmem:[#allocation2 + $0x18] sm:$0xff] %vm368_vm0, %v1711_v0 }
  0x1e   : > { %373 = vst.msk [vmem:[#allocation2 + $0x20] sm:$0xff] %vm368_vm0, %v1711_v0 }
  0x1f   : > { %375 = vst.msk [vmem:[#allocation3] sm:$0x1] %vm374_vm1, %v1711_v0  ;;  %376 = vst.msk [vmem:[#allocation4] sm:$0x1] %vm374_vm1, %v1711_v0 }
  0x20 PF: > { %v1628_v1 = vld [vmem:[%s2020_s2 + $0x38] sm:$0xff]   ;;  %v1712_v2 = vmov 0   ;;  %v1629_v3 = vld [vmem:[%s2020_s2 + $0x30] sm:$0xff]   ;;  %v1630_v4 = vld [vmem:[%s2020_s2 + $0x28] sm:$0xff]   ;;  %vm467_vm2 = vcmask 154624   ;;  %vm471_vm3 = vcmask 1040384   ;;  %v519_v19 = vlaneseq }
  0x21   : > { %478 = vmatprep.subr.bf16.mxu0 %v1712_v2  ;;  %v377_v5 = vld [vmem:[%s344_s22] sm:$0xff]  ;;  %v1632_v8 = vld [vmem:[%s2020_s2 + $0x18] sm:$0xff]   ;;  %v1633_v9 = vld [vmem:[%s2020_s2 + $0x10] sm:$0xff]   ;;  %vm472_vm4 = vcmask 1041408   ;;  %v1713_v11 = vmov 65535   ;;  %s1387_s18 = sshll.u32 %s1693_s27, 3 }
  0x22   : > { %479 = vmatpush1.bf16.msra.mxu0 %v1628_v1  ;;  %v1631_v6 = vld [vmem:[%s2020_s2 + $0x20] sm:$0xff]   ;;  %v1375_v7 = vcombine.high %v377_v5, %v377_v5  ;;  %v1634_v10 = vld [vmem:[%s2020_s2 + $0x8] sm:$0xff]   ;;  %v473_v12 = vsel %vm471_vm3, 4294967295, %v1713_v11  ;;  %v1374_v18 = vcombine.low %v377_v5, %v377_v5  ;;  %v520_v20 = vshrl.u32 %v519_v19, 7  ;;  %s1291_s23 = scalar_lea.vmem [#allocation2], %s1387_s18 }
  0x23   : > { %480 = vmatprep.subr.bf16.mxu0 %v1712_v2  ;;  %v1635_v13 = vld [vmem:[%s2020_s2] sm:$0xff]   ;;  %v1636_v14 = vld [vmem:[%s2020_s2 + $0x48] ss:$0 sps:$4 sm:$0x33]   ;;  %v474_v15 = vsel %vm472_vm4, %v473_v12, 0  ;;  %v521_v21 = vstv %s1387_s18  ;;  %vm528_vm6 = vcmask 261120  }
  0x24   : > { %1386 = vmatprep.mubr.msk.bf16.mxu0 %vm467_vm2, %v1375_v7  ;;  %v476_v16 = vand.u32 %v1636_v14, %v474_v15  ;;  %v1637_v17 = vld [vmem:[%s2020_s2 + $0x40] sm:$0xff]   ;;  %v522_v22 = vadd.s32 %v521_v21, %v520_v20  ;;  %vm537_vm7 = vcmask 253952  }
  0x25   : > { %v1373_v23 = vld [vmem:[%s2021_s3] ss:$0 sm:$0xff] }
  0x26   : > { %481 = vmatpush1.bf16.msra.mxu0 %v1629_v3  ;;  %vm523_vm5 = vcmp.lt.s32.totalorder %v522_v22, 18  ;;  %v527_v42 = vld [vmem:[#allocation3] sm:$0x1]  ;;  %v539_v45 = vld [vmem:[#allocation4] sm:$0x1] }
  0x27   : > { %482 = vmatprep.subr.bf16.mxu0 %v1712_v2 }
  0x2a   : > { %483 = vmatpush1.bf16.msra.mxu0 %v1630_v4 }
  0x2b   : > { %484 = vmatprep.subr.bf16.mxu0 %v1712_v2 }
  0x2e   : > { %485 = vmatpush1.bf16.msra.mxu0 %v1631_v6 }
  0x2f   : > { %486 = vmatprep.subr.bf16.mxu0 %v1712_v2 }
  0x32   : > { %487 = vmatpush1.bf16.msra.mxu0 %v1632_v8 }
  0x33   : > { %488 = vmatprep.subr.bf16.mxu0 %v1712_v2 }
  0x36   : > { %489 = vmatpush1.bf16.msra.mxu0 %v1633_v9 }
  0x37   : > { %490 = vmatprep.subr.bf16.mxu0 %v1712_v2 }
  0x3a   : > { %491 = vmatpush1.bf16.msra.mxu0 %v1634_v10 }
  0x3b   : > { %492 = vmatprep.subr.bf16.mxu0 %v1712_v2 }
  0x3e   : > { %493 = vmatpush1.bf16.msra.mxu0 %v1635_v13 }
  0x3f   : > { %506 = vmatprep.subr.bf16.mxu0 %v1712_v2 }
  0x42   : > { %507 = vmatpush2.bf16.msra.mxu0 %v476_v16 }
  0x43   : > { %508 = vmatprep.subr.bf16.mxu0 %v1712_v2 }
  0x46   : > { %509 = vmatpush2.bf16.msra.mxu0 %v1637_v17 }
  0x49   : > { %511 = vmatmul.mubr.bf16.vlgmr.msra.gmra.mxu0 %v1374_v18 }
 0x109   : > { %v512_v24 = vpop.f32.mrf.mxu0 }
 0x10a   : > { %v513_v25 = vadd.f32 %v1373_v23, %v512_v24 }
 0x10b   : > { %v514_v26 = vpop.f32.mrf.mxu0 }
 0x10c   : > { %v526_v27 = vsel %vm523_vm5, %v513_v25, 0.0  ;;  %1389 = vst.msk [vmem:[%s1291_s23 + $0x8] sm:$0xff] %vm528_vm6, %v513_v25 }
 0x10d   : > { %v529_v28 = vsel %vm528_vm6, %v526_v27, 0.0  ;;  %v540_v29 = vmul.f32 %v526_v27, %v526_v27  ;;  %v515_v30 = vpop.f32.mrf.mxu0 }
 0x10e   : > { %v530_v31 = vrot.slane %v529_v28, 4 }
 0x10f   : > { %v541_v32 = vsel %vm528_vm6, %v540_v29, 0.0  ;;  %v516_v33 = vpop.f32.mrf.mxu0 }
 0x110   : > { %v531_v34 = vadd.f32 %v530_v31, %v529_v28  ;;  %v542_v35 = vrot.slane %v541_v32, 4 }
 0x112   : > { %v532_v36 = vrot.slane %v531_v34, 2  ;;  %v543_v37 = vadd.f32 %v542_v35, %v541_v32 }
 0x114   : > { %v533_v38 = vadd.f32 %v532_v36, %v531_v34  ;;  %v544_v39 = vrot.slane %v543_v37, 2 }
 0x116   : > { %v534_v40 = vrot.slane %v533_v38, 1  ;;  %v545_v41 = vadd.f32 %v544_v39, %v543_v37 }
 0x118   : > { %v535_v43 = vadd.f32 %v534_v40, %v533_v38  ;;  %v546_v44 = vrot.slane %v545_v41, 1 }
 0x11a   : > { %v536_v46 = vadd.f32 %v535_v43, %v527_v42  ;;  %v547_v47 = vadd.f32 %v546_v44, %v545_v41 }
 0x11c   : > { %538 = vst.msk [vmem:[#allocation3] sm:$0x1] %vm537_vm7, %v536_v46  ;;  %v548_v48 = vadd.f32 %v547_v47, %v539_v45 }
 0x11e   : > { %549 = vst.msk [vmem:[#allocation4] sm:$0x1] %vm537_vm7, %v548_v48 }
 0x11f PF: > { %p1390_p9 = scmp.ne.s32.totalorder %s1697_s28, 1 }
 0x120   : > { %p1391_p10 = scmp.ne.s32.totalorder (!%p1390_p9), %s1693_s27, 0 }
 0x121   : > { %556 = sbr.rel (%p1390_p9) target bundleno = 703 (0x2bf), region = 64 }
 0x126   : > { %560 = sbr.rel (%p1391_p10) target bundleno = 331 (0x14b), region = 68 }
 0x12b   : > { %v561_v49 = vld [vmem:[#allocation3] sm:$0x1]  ;;  %v563_v50 = vld [vmem:[#allocation4] sm:$0x1]  ;;  %v568_v57 = vld [vmem:[%s2022_s4] sm:$0x1] }
 0x12c   : > { %v562_v51 = vmul.f32 0.055555556, %v561_v49  ;;  %v564_v52 = vmul.f32 0.055555556, %v563_v50  ;;  %vm572_vm8 = vcmask 253952  }
 0x12d   : > { %v574_v60 = vld [vmem:[%s2023_s5] sm:$0x1] }
 0x12e   : > { %v565_v53 = vmul.f32 %v562_v51, %v562_v51 }
 0x130   : > { %v566_v54 = vsub.f32 %v564_v52, %v565_v53 }
 0x132   : > { %v567_v55 = vmax.f32 %v566_v54, 0.0 }
 0x134   : > { %v569_v56 = vadd.f32 1e-05, %v567_v55 }
 0x136   : > { %1640 = vrsqrt.f32 %v569_v56 }
 0x143   : > { %v1641_v58 = vpop.eup %1640 }
 0x144   : > { %v571_v59 = vmul.f32 %v1641_v58, %v568_v57 }
 0x146   : > { %573 = vst.msk [vmem:[#allocation5] sm:$0x1] %vm572_vm8, %v571_v59  ;;  %v575_v61 = vmul.f32 %v571_v59, %v562_v51 }
 0x148   : > { %v576_v62 = vsub.f32 %v574_v60, %v575_v61 }
 0x14a   : > { %577 = vst.msk [vmem:[#allocation6] sm:$0x1] %vm572_vm8, %v576_v62 }
 0x14b PF: > { %v580_v63 = vld [vmem:[%s1811_s19] sm:$0xff]  ;;  %v1651_v0 = vld [vmem:[%s2024_s6 + $0x8] sm:$0xff]   ;;  %v1714_v1 = vmov 0   ;;  %v1715_v2 = vmov 2   ;;  %v1716_v3 = vmov 0.0   ;;  %v1653_v4 = vld [vmem:[%s2024_s6 + $0x18] sm:$0xff]  }
 0x14c   : > { %1642 = vset.pattern.permute.xlu0 %v1714_v1  ;;  %1644 = vset.pattern.permute.xlu1 %v1715_v2  ;;  %v1652_v5 = vld [vmem:[%s2024_s6] sm:$0xff]   ;;  %v1717_v6 = vmov 1   ;;  %v1718_v7 = vmov 3   ;;  %vm1719_vm9 = vmmov 0   ;;  %v1655_v8 = vld [vmem:[%s2024_s6 + $0x10] sm:$0xff]   ;;  %v1720_v9 = vmov 4  }
 0x14d   : > { %609 = vperm.xlu0 %1642, %v580_v63   ;;  %753 = vperm.xlu1 %1644, %v580_v63   ;;  %v1721_v10 = vmov 5   ;;  %v1722_v11 = vmov 6   ;;  %v1723_v12 = vmov 8   ;;  %v1724_v13 = vmov 7   ;;  %s1393_s20 = sshll.u32 %s1693_s27, 3  ;;  %v1654_v28 = vld [vmem:[%s2024_s6 + $0x28] sm:$0xff]  }
 0x14e   : > { %1502 = vmatprep.subr.bf16.mxu0 %v1716_v3  ;;  %1510 = vmatprep.subr.bf16.mxu1 %v1716_v3  ;;  %s1889_s21 = scalar_lea.vmem [#allocation2], %s1393_s20  ;;  %v1892_v15 = vld [vmem:[#allocation5] ss:$0 sm:$0xff]  ;;  %vm630_vm10 = vcmask 261120   ;;  %v1656_v37 = vld [vmem:[%s2024_s6 + $0x20] sm:$0xff]   ;;  %v1657_v39 = vld [vmem:[%s2024_s6 + $0x38] sm:$0xff]  }
 0x14f   : > { %1503 = vmatpush3.bf16.msra.mxu0 %v1651_v0  ;;  %1511 = vmatpush3.bf16.msra.mxu1 %v1653_v4  ;;  %v1394_v14 = vld [vmem:[%s1889_s21 + $0x4] sm:$0xff]  ;;  %v1659_v49 = vld [vmem:[%s2024_s6 + $0x30] sm:$0xff]   ;;  %v1661_v55 = vld [vmem:[%s2024_s6 + $0x58] sm:$0xff]  }
 0x150   : > { %1504 = vmatprep.subr.bf16.mxu0 %v1716_v3  ;;  %1506 = vmatprep.mubr.msk.bf16.mxu0 %vm1719_vm9, %v1716_v3  ;;  %v599_v16 = vmul.f32 %v1892_v15, %v1394_v14  ;;  %v1401_v18 = vld [vmem:[%s1889_s21 + $0x5] sm:$0xff]  ;;  %v1663_v2 = vld [vmem:[%s2024_s6 + $0x50] sm:$0xff]  }
 0x151   : > { %1643 = vset.pattern.permute.xlu0 %v1717_v6  ;;  %1645 = vset.pattern.permute.xlu1 %v1718_v7  ;;  %v1895_v17 = vld [vmem:[#allocation6] ss:$0 sm:$0xff]  ;;  %v678_v21 = vmul.f32 %v1401_v18, %v1892_v15  ;;  %v1660_v53 = vld [vmem:[%s2024_s6 + $0x40] sm:$0xff]   ;;  %v1464_v1 = vld [vmem:[%s1889_s21 + $0xc] sm:$0xff] }
 0x152   : > { %681 = vperm.xlu0 %1643, %v580_v63   ;;  %825 = vperm.xlu1 %1645, %v580_v63   ;;  %v1410_v19 = vld [vmem:[%s1889_s21 + $0x6] sm:$0xff]  ;;  %v606_v20 = vadd.f32 %v1895_v17, %v599_v16  ;;  %v1667_v16 = vld [vmem:[%s2024_s6 + $0x70] sm:$0xff]  }
 0x153   : > { %1505 = vmatpush3.bf16.msra.mxu0 %v1652_v5  ;;  %1512 = vmatprep.subr.bf16.mxu1 %v1716_v3  ;;  %v750_v22 = vmul.f32 %v1410_v19, %v1892_v15  ;;  %v1419_v26 = vld [vmem:[%s1889_s21 + $0x7] sm:$0xff]  ;;  %v679_v27 = vadd.f32 %v1895_v17, %v678_v21  ;;  %v1181_v5 = vmul.f32 %v1464_v1, %v1892_v15 }
 0x154   : > { %1518 = vmatprep.subr.bf16.mxu0 %v1716_v3  ;;  %1513 = vmatpush3.bf16.msra.mxu1 %v1655_v8  ;;  %v1428_v29 = vld [vmem:[%s1889_s21 + $0x8] sm:$0xff]  ;;  %v822_v32 = vmul.f32 %v1419_v26, %v1892_v15  ;;  %v1664_v7 = vld [vmem:[%s2024_s6 + $0x60] sm:$0xff]  }
 0x155   : > { %1514 = vmatprep.mubr.msk.bf16.mxu1 %vm1719_vm9, %v1716_v3  ;;  %1526 = vmatprep.subr.bf16.mxu1 %v1716_v3  ;;  %v751_v31 = vadd.f32 %v1895_v17, %v750_v22  ;;  %v893_v35 = vmul.f32 %v1428_v29, %v1892_v15  ;;  %v1437_v40 = vld [vmem:[%s1889_s21 + $0x9] sm:$0xff]  ;;  %v1668_v19 = vld [vmem:[%s2024_s6 + $0x80] sm:$0xff]  }
 0x156   : > { %1646 = vset.pattern.permute.xlu1 %v1720_v9  ;;  %1647 = vset.pattern.permute.xlu0 %v1721_v10  ;;  %v823_v42 = vadd.f32 %v1895_v17, %v822_v32  ;;  %v1658_v44 = vld [vmem:[%s2024_s6 + $0x48] sm:$0xff]   ;;  %v965_v46 = vmul.f32 %v1437_v40, %v1892_v15  ;;  %v1665_v9 = vld [vmem:[%s2024_s6 + $0x78] sm:$0xff]   ;;  %v1392_v26 = vld [vmem:[%s2025_s7] ss:$0 sm:$0xff] }
 0x157   : > { %896 = vperm.xlu1 %1646, %v580_v63   ;;  %968 = vperm.xlu0 %1647, %v580_v63   ;;  %v894_v43 = vadd.f32 %v1895_v17, %v893_v35  ;;  %v1446_v47 = vld [vmem:[%s1889_s21 + $0xa] sm:$0xff] }
 0x158   : > { %v1037_v52 = vmul.f32 %v1446_v47, %v1892_v15  ;;  %v966_v54 = vadd.f32 %v1895_v17, %v965_v46  ;;  %v1455_v57 = vld [vmem:[%s1889_s21 + $0xb] sm:$0xff] }
 0x159   : > { %v1109_v0 = vmul.f32 %v1455_v57, %v1892_v15  ;;  %v1666_v14 = vld [vmem:[%s2024_s6 + $0x88] sm:$0xff]  }
 0x15a   : > { %v1038_v61 = vadd.f32 %v1895_v17, %v1037_v52 }
 0x15b   : > { %1648 = vset.pattern.permute.xlu1 %v1722_v11  ;;  %1650 = vset.pattern.permute.xlu0 %v1723_v12  ;;  %v1110_v8 = vadd.f32 %v1895_v17, %v1109_v0  ;;  %v1182_v12 = vadd.f32 %v1895_v17, %v1181_v5 }
 0x15c   : > { %1040 = vperm.xlu1 %1648, %v580_v63   ;;  %1184 = vperm.xlu0 %1650, %v580_v63  }
 0x160   : > { %1649 = vset.pattern.permute.xlu1 %v1724_v13 }
 0x161   : > { %1112 = vperm.xlu1 %1649, %v580_v63   ;;  %v1662_v63 = vld [vmem:[%s2024_s6 + $0x68] sm:$0xff]  }
 0x1c8   : > { %v610_v23 = vpop.permute.xlu0 %609  ;;  %v754_v24 = vpop.permute.xlu1 %753 }
 0x1c9   : > { %v612_v25 = vmul.f32 %v610_v23, %v606_v20  ;;  %v756_v38 = vmul.f32 %v754_v24, %v751_v31 }
 0x1cb   : > { %v613_v30 = vpack.c.bf16 %v612_v25, %v612_v25  ;;  %v757_v48 = vpack.c.bf16 %v756_v38, %v756_v38 }
 0x1cd   : > { %v682_v33 = vpop.permute.xlu0 %681  ;;  %1507 = vmatmul.mubr.msk.bf16.vlgmr.msra.gmra.mxu0 %vm630_vm10, %v613_v30  ;;  %v826_v34 = vpop.permute.xlu1 %825 }
 0x1ce   : > { %v684_v36 = vmul.f32 %v682_v33, %v679_v27  ;;  %1519 = vmatpush3.bf16.msra.mxu0 %v1654_v28  ;;  %1522 = vmatprep.mubr.msk.bf16.mxu0 %vm1719_vm9, %v1716_v3  ;;  %v828_v50 = vmul.f32 %v826_v34, %v823_v42 }
 0x1cf   : > { %1520 = vmatprep.subr.bf16.mxu0 %v1716_v3 }
 0x1d0   : > { %v685_v41 = vpack.c.bf16 %v684_v36, %v684_v36  ;;  %v829_v58 = vpack.c.bf16 %v828_v50, %v828_v50 }
 0x1d2   : > { %1521 = vmatpush3.bf16.msra.mxu0 %v1656_v37  ;;  %1515 = vmatmul.mubr.msk.bf16.vlgmr.msra.gmra.mxu1 %vm630_vm10, %v685_v41  ;;  %v897_v45 = vpop.permute.xlu1 %896  ;;  %v969_v56 = vpop.permute.xlu0 %968 }
 0x1d3   : > { %1527 = vmatpush3.bf16.msra.mxu1 %v1657_v39  ;;  %1534 = vmatprep.subr.bf16.mxu0 %v1716_v3  ;;  %v899_v51 = vmul.f32 %v897_v45, %v894_v43  ;;  %v971_v62 = vmul.f32 %v969_v56, %v966_v54 }
 0x1d4   : > { %1528 = vmatprep.subr.bf16.mxu1 %v1716_v3  ;;  %1530 = vmatprep.mubr.msk.bf16.mxu1 %vm1719_vm9, %v1716_v3 }
 0x1d5   : > { %1523 = vmatmul.mubr.msk.bf16.vlgmr.msra.gmra.mxu0 %vm630_vm10, %v757_v48  ;;  %v900_v59 = vpack.c.bf16 %v899_v51, %v899_v51  ;;  %v972_v6 = vpack.c.bf16 %v971_v62, %v971_v62 }
 0x1d6   : > { %1535 = vmatpush3.bf16.msra.mxu0 %v1658_v44  ;;  %1538 = vmatprep.mubr.msk.bf16.mxu0 %vm1719_vm9, %v1716_v3 }
 0x1d7   : > { %1529 = vmatpush3.bf16.msra.mxu1 %v1659_v49  ;;  %1536 = vmatprep.subr.bf16.mxu0 %v1716_v3  ;;  %v1041_v60 = vpop.permute.xlu1 %1040  ;;  %v1185_v15 = vpop.permute.xlu0 %1184 }
 0x1d8   : > { %1542 = vmatprep.subr.bf16.mxu1 %v1716_v3  ;;  %v1043_v4 = vmul.f32 %v1041_v60, %v1038_v61  ;;  %v1187_v17 = vmul.f32 %v1185_v15, %v1182_v12 }
 0x1da   : > { %1537 = vmatpush3.bf16.msra.mxu0 %v1660_v53  ;;  %1531 = vmatmul.mubr.msk.bf16.vlgmr.msra.gmra.mxu1 %vm630_vm10, %v829_v58  ;;  %v1044_v11 = vpack.c.bf16 %v1043_v4, %v1043_v4  ;;  %v1188_v20 = vpack.c.bf16 %v1187_v17, %v1187_v17 }
 0x1db   : > { %1543 = vmatpush3.bf16.msra.mxu1 %v1661_v55  ;;  %1550 = vmatprep.subr.bf16.mxu0 %v1716_v3 }
 0x1dc   : > { %1544 = vmatprep.subr.bf16.mxu1 %v1716_v3  ;;  %1546 = vmatprep.mubr.msk.bf16.mxu1 %vm1719_vm9, %v1716_v3  ;;  %v1113_v10 = vpop.permute.xlu1 %1112 }
 0x1dd   : > { %1539 = vmatmul.mubr.msk.bf16.vlgmr.msra.gmra.mxu0 %vm630_vm10, %v900_v59  ;;  %v1115_v13 = vmul.f32 %v1113_v10, %v1110_v8 }
 0x1de   : > { %1551 = vmatpush3.bf16.msra.mxu0 %v1662_v63  ;;  %1554 = vmatprep.mubr.msk.bf16.mxu0 %vm1719_vm9, %v1716_v3 }
 0x1df   : > { %1545 = vmatpush3.bf16.msra.mxu1 %v1663_v2  ;;  %1552 = vmatprep.subr.bf16.mxu0 %v1716_v3  ;;  %v1116_v18 = vpack.c.bf16 %v1115_v13, %v1115_v13 }
 0x1e0   : > { %1558 = vmatprep.subr.bf16.mxu1 %v1716_v3 }
 0x1e2   : > { %1553 = vmatpush3.bf16.msra.mxu0 %v1664_v7  ;;  %1547 = vmatmul.mubr.msk.bf16.vlgmr.msra.gmra.mxu1 %vm630_vm10, %v972_v6 }
 0x1e3   : > { %1559 = vmatpush3.bf16.msra.mxu1 %v1665_v9  ;;  %1566 = vmatprep.subr.bf16.mxu0 %v1716_v3 }
 0x1e4   : > { %1560 = vmatprep.subr.bf16.mxu1 %v1716_v3  ;;  %1562 = vmatprep.mubr.msk.bf16.mxu1 %vm1719_vm9, %v1716_v3 }
 0x1e5   : > { %1555 = vmatmul.mubr.msk.bf16.vlgmr.msra.gmra.mxu0 %vm630_vm10, %v1044_v11 }
 0x1e6   : > { %1567 = vmatpush3.bf16.msra.mxu0 %v1666_v14  ;;  %1570 = vmatprep.mubr.msk.bf16.mxu0 %vm1719_vm9, %v1716_v3 }
 0x1e7   : > { %1561 = vmatpush3.bf16.msra.mxu1 %v1667_v16  ;;  %1568 = vmatprep.subr.bf16.mxu0 %v1716_v3 }
 0x1ea   : > { %1569 = vmatpush3.bf16.msra.mxu0 %v1668_v19  ;;  %1563 = vmatmul.mubr.msk.bf16.vlgmr.msra.gmra.mxu1 %vm630_vm10, %v1116_v18 }
 0x1ed   : > { %1571 = vmatmul.mubr.msk.bf16.vlgmr.msra.gmra.mxu0 %vm630_vm10, %v1188_v20 }
 0x28d   : > { %v668_v21 = vpop.f32.mrf.mxu0 }
 0x28e   : > { %v674_v30 = vadd.f32 %v1392_v26, %v668_v21 }
 0x28f   : > { %v1508_v22 = vpop.f32.mrf.mxu0 }
 0x291   : > { %v671_v23 = vpop.f32.mrf.mxu0 }
 0x292   : > { %v740_v24 = vpop.f32.mrf.mxu1 }
 0x293   : > { %v1509_v25 = vpop.f32.mrf.mxu0  ;;  %v746_v32 = vadd.f32 %v740_v24, %v674_v30 }
 0x294   : > { %v1516_v27 = vpop.f32.mrf.mxu1 }
 0x295   : > { %v812_v28 = vpop.f32.mrf.mxu0 }
 0x296   : > { %v743_v29 = vpop.f32.mrf.mxu1  ;;  %v818_v37 = vadd.f32 %v812_v28, %v746_v32 }
 0x297   : > { %v1524_v3 = vpop.f32.mrf.mxu0 }
 0x298   : > { %v1517_v31 = vpop.f32.mrf.mxu1 }
 0x299   : > { %v815_v33 = vpop.f32.mrf.mxu0 }
 0x29a   : > { %v884_v34 = vpop.f32.mrf.mxu1 }
 0x29b   : > { %v1525_v35 = vpop.f32.mrf.mxu0  ;;  %v890_v40 = vadd.f32 %v884_v34, %v818_v37 }
 0x29c   : > { %v1532_v36 = vpop.f32.mrf.mxu1 }
 0x29d   : > { %v955_v38 = vpop.f32.mrf.mxu0 }
 0x29e   : > { %v887_v39 = vpop.f32.mrf.mxu1  ;;  %v961_v45 = vadd.f32 %v955_v38, %v890_v40 }
 0x29f   : > { %v1540_v41 = vpop.f32.mrf.mxu0 }
 0x2a0   : > { %v1533_v42 = vpop.f32.mrf.mxu1 }
 0x2a1   : > { %v958_v43 = vpop.f32.mrf.mxu0 }
 0x2a2   : > { %v1027_v44 = vpop.f32.mrf.mxu1 }
 0x2a3   : > { %v1541_v46 = vpop.f32.mrf.mxu0  ;;  %v1033_v48 = vadd.f32 %v1027_v44, %v961_v45 }
 0x2a4   : > { %v1548_v47 = vpop.f32.mrf.mxu1 }
 0x2a5   : > { %v1099_v49 = vpop.f32.mrf.mxu0 }
 0x2a6   : > { %v1030_v50 = vpop.f32.mrf.mxu1  ;;  %v1105_v53 = vadd.f32 %v1099_v49, %v1033_v48 }
 0x2a7   : > { %v1556_v51 = vpop.f32.mrf.mxu0 }
 0x2a8   : > { %v1549_v52 = vpop.f32.mrf.mxu1 }
 0x2a9   : > { %v1102_v54 = vpop.f32.mrf.mxu0 }
 0x2aa   : > { %v1171_v55 = vpop.f32.mrf.mxu1 }
 0x2ab   : > { %v1177_v56 = vadd.f32 %v1171_v55, %v1105_v53  ;;  %v1557_v57 = vpop.f32.mrf.mxu0 }
 0x2ac   : > { %v1564_v58 = vpop.f32.mrf.mxu1 }
 0x2ad   : > { %v1243_v59 = vpop.f32.mrf.mxu0 }
 0x2ae   : > { %v1249_v60 = vadd.f32 %v1243_v59, %v1177_v56  ;;  %v1174_v61 = vpop.f32.mrf.mxu1 }
 0x2af   : > { %v1572_v62 = vpop.f32.mrf.mxu0 }
 0x2b0   : > { %1669 = vtanh.f32 %v1249_v60  ;;  %v1565_v63 = vpop.f32.mrf.mxu1 }
 0x2b1   : > { %v1246_v0 = vpop.f32.mrf.mxu0 }
 0x2b3   : > { %v1573_v1 = vpop.f32.mrf.mxu0 }
 0x2bd   : > { %v1670_v2 = vpop.eup %1669 }
 0x2be   : > { %1251 = vst [vmem:[%s1819_s25] sm:$0xff] %v1670_v2 }
 0x2bf PF: > { %s18_s9 = sadd.s32 1, %s1709_s9   ;;  %s2027_s27 = smov %s1701_s29 }
 0x2c0   : > { %p15_p11 = scmp.ge.s32.totalorder %s18_s9, 8   ;;  %s2028_s28 = smov %s1705_s30 }
 0x2c1   : > { %s2029_s29 = smov %s2032_s10  ;;  %s2030_s30 = smov %s2036_s11 }
 0x2c2   :  { %17 = sbr.rel (!%p15_p11) target bundleno = 3 (0x3), region = 119 }

</bundles_post_ra>
